<compile_context>
chip_gen: v7x
topology: tpu7x:2x2x1
jax: 0.10.0
libtpu: 0.0.40
codegen_flags: <defaults>
</compile_context>

<pallas_src>
import jax
import jax.numpy as jnp
from jax.experimental import pallas as pl
from jax.experimental.pallas import tpu as pltpu


def _anrs_kernel(cu_ref, ci_ref, w_ref, b_ref, wp_ref, bp_ref, out_ref):
    """One batch tile.

    cu_ref/ci_ref : (TB, in_dim)      user / item concatenated aspect reps
    w_ref         : (2*in_dim, 2*h1)  block-diagonal fused [userFC | itemFC] weight
    b_ref         : (1, 2*h1)         fused [userFC_b | itemFC_b] bias
    wp_ref        : (1, 2*h1)         prediction weight row
    bp_ref        : (1, 1)  (SMEM)    prediction bias scalar
    out_ref       : (1, TB)           lane-dense rating output
    """
    # Fused user+item FC: concat along K against a block-diagonal weight so a
    # single MXU matmul (K=2*in_dim, N=2*h1) replaces two narrow ones.
    x = jnp.concatenate([cu_ref[...], ci_ref[...]], axis=-1)           # (TB, 2*in_dim)
    h = jnp.dot(x, w_ref[...], preferred_element_type=jnp.float32)     # (TB, 2*h1) = [u | it]
    h = jnp.maximum(h + b_ref[...], 0.0)                               # bias + ReLU
    # TODO(synk): dropout omitted (eval-mode identity); training-mode dropout
    # would use pltpu.prng_seed + pltpu.prng_random_bits.
    # Prediction (out_features = 1): VPU multiply + lane reduction — avoids a
    # wasteful (TB, 2*h1) x (2*h1, 1) MXU matmul and keeps the output lane-dense.
    z = h * wp_ref[...]                                                # VPU
    pred = jnp.sum(z, axis=-1) + bp_ref[0, 0]                          # (TB,) XLU reduce
    out_ref[...] = pred.reshape(1, -1).astype(out_ref.dtype)           # (1, TB) unmasked store


def prepare_params(params):
    """One-time parameter prep: transpose / fuse weights into kernel layout."""
    h1, in_dim = params["userFC_w"].shape
    w = jnp.zeros((2 * in_dim, 2 * h1), jnp.float32)
    w = w.at[:in_dim, :h1].set(params["userFC_w"].T)
    w = w.at[in_dim:, h1:].set(params["itemFC_w"].T)
    b = jnp.concatenate([params["userFC_b"], params["itemFC_b"]]).reshape(1, 2 * h1)
    wp = params["prediction_w"].reshape(1, 2 * h1)
    bp = params["prediction_b"].reshape(1, 1).astype(jnp.float32)
    return {"w_fused": w, "b_fused": b, "wp_row": wp, "bp": bp}


def _round_up(x, m):
    return ((x + m - 1) // m) * m


def anrs_rating_pred(userAspRep, itemAspRep, prep, *, tb_max=1024):
    """userAspRep, itemAspRep: (bsz, num_aspects, h1) float32. Returns (bsz, 1)."""
    bsz, num_aspects, h1 = userAspRep.shape
    in_dim = num_aspects * h1

    cu = userAspRep.reshape(bsz, in_dim)
    ci = itemAspRep.reshape(bsz, in_dim)

    # Batch tile: multiple of 128 (lane-dense output), capped for v7x VMEM.
    tb = min(tb_max, _round_up(bsz, 128))
    bsz_p = _round_up(bsz, tb)
    if bsz_p != bsz:
        pad = bsz_p - bsz
        cu = jnp.pad(cu, ((0, pad), (0, 0)))
        ci = jnp.pad(ci, ((0, pad), (0, 0)))
    nb = bsz_p // tb

    resident = lambda shape: pl.BlockSpec(shape, lambda i: (0, 0))

    out_row = pl.pallas_call(
        _anrs_kernel,
        out_shape=jax.ShapeDtypeStruct((1, bsz_p), jnp.float32),
        grid=(nb,),
        in_specs=[
            pl.BlockSpec((tb, in_dim), lambda i: (i, 0)),      # concatUserRep tile
            pl.BlockSpec((tb, in_dim), lambda i: (i, 0)),      # concatItemRep tile
            resident((2 * in_dim, 2 * h1)),                    # fused block-diag FC weight
            resident((1, 2 * h1)),                             # fused FC bias
            resident((1, 2 * h1)),                             # prediction weight row
            pl.BlockSpec(memory_space=pltpu.MemorySpace.SMEM), # prediction bias scalar
        ],
        out_specs=pl.BlockSpec((1, tb), lambda i: (0, i)),     # lane-dense output
        compiler_params=pltpu.CompilerParams(
            dimension_semantics=("parallel",),
            vmem_limit_bytes=32 << 20,
        ),
    )(cu, ci, prep["w_fused"], prep["b_fused"], prep["wp_row"], prep["bp"])

    return out_row[0, :bsz].reshape(bsz, 1)


def init_params(key, num_aspects, h1):
    in_dim = num_aspects * h1
    ks = jax.random.split(key, 6)
    uni = lambda k, shape, lim: jax.random.uniform(
        k, shape, jnp.float32, minval=-lim, maxval=lim)
    # weights: uniform(-0.01, 0.01) as in the module __init__
    # biases: PyTorch default Linear init uniform(-1/sqrt(fan_in), 1/sqrt(fan_in))
    return {
        "userFC_w": uni(ks[0], (h1, in_dim), 0.01),
        "userFC_b": uni(ks[1], (h1,), 1.0 / jnp.sqrt(in_dim)),
        "itemFC_w": uni(ks[2], (h1, in_dim), 0.01),
        "itemFC_b": uni(ks[3], (h1,), 1.0 / jnp.sqrt(in_dim)),
        "prediction_w": uni(ks[4], (1, 2 * h1), 0.01),
        "prediction_b": uni(ks[5], (1,), 1.0 / jnp.sqrt(2 * h1)),
    }


def _reference(userAspRep, itemAspRep, params):
    bsz = userAspRep.shape[0]
    cu = userAspRep.reshape(bsz, -1)
    ci = itemAspRep.reshape(bsz, -1)
    u = jnp.maximum(cu @ params["userFC_w"].T + params["userFC_b"], 0.0)
    it = jnp.maximum(ci @ params["itemFC_w"].T + params["itemFC_b"], 0.0)
    ui = jnp.concatenate([u, it], axis=1)
    return ui @ params["prediction_w"].T + params["prediction_b"]


if __name__ == "__main__":
    bsz, num_aspects, h1 = 8, 4, 32  # num_aspects*h1 = 128 (lane-aligned)
    key = jax.random.PRNGKey(0)
    k_u, k_i, k_p = jax.random.split(key, 3)
    userAspRep = jax.random.normal(k_u, (bsz, num_aspects, h1), jnp.float32)
    itemAspRep = jax.random.normal(k_i, (bsz, num_aspects, h1), jnp.float32)
    params = init_params(k_p, num_aspects, h1)
    prep = prepare_params(params)

    out = anrs_rating_pred(userAspRep, itemAspRep, prep)
    out = jax.block_until_ready(out)

    ref = _reference(userAspRep, itemAspRep, params)
    assert out.shape == (bsz, 1), out.shape
    assert jnp.allclose(out, ref, atol=1e-5, rtol=1e-5), (out, ref)
    print("KERNEL_OK")
</pallas_src>

<mosaic_0001>
module attributes {stable_mosaic.version = 11 : i64} {
  func.func @_anrs_kernel(%arg0: i32, %arg1: memref<128x128xf32, #tpu.memory_space<vmem>>, %arg2: memref<128x128xf32, #tpu.memory_space<vmem>>, %arg3: memref<256x64xf32, #tpu.memory_space<vmem>>, %arg4: memref<1x64xf32, #tpu.memory_space<vmem>>, %arg5: memref<1x64xf32, #tpu.memory_space<vmem>>, %arg6: memref<1x1xf32, #tpu.memory_space<smem>>, %arg7: memref<1x128xf32, #tpu.memory_space<vmem>>) attributes {dimension_semantics = [#tpu.dimension_semantics<parallel>], iteration_bounds = array<i64: 1>, scalar_prefetch = 0 : i64, scratch_operands = 0 : i64, tpu.core_type = #tpu.core_type<tc>, window_params = [{transform_indices = @transform_0, window_bounds = array<i64: 128, 128>}, {transform_indices = @transform_1, window_bounds = array<i64: 128, 128>}, {pipeline_mode = #tpu.pipeline_mode<synchronous>, transform_indices = @transform_2, window_bounds = array<i64: 256, 64>}, {pipeline_mode = #tpu.pipeline_mode<synchronous>, transform_indices = @transform_3, window_bounds = array<i64: 1, 64>}, {pipeline_mode = #tpu.pipeline_mode<synchronous>, transform_indices = @transform_4, window_bounds = array<i64: 1, 64>}, {transform_indices = @transform_5, window_bounds = array<i64: 1, 1>}, {transform_indices = @transform_6, window_bounds = array<i64: 1, 128>}]} {
    %c0 = arith.constant 0 : index
    %c0_0 = arith.constant 0 : index
    %0 = vector.load %arg1[%c0, %c0_0] : memref<128x128xf32, #tpu.memory_space<vmem>>, vector<128x128xf32>
    %c0_1 = arith.constant 0 : index
    %c0_2 = arith.constant 0 : index
    %1 = vector.load %arg2[%c0_1, %c0_2] : memref<128x128xf32, #tpu.memory_space<vmem>>, vector<128x128xf32>
    %2 = tpu.concatenate %0, %1 in 1 : vector<128x128xf32>, vector<128x128xf32> -> vector<128x256xf32>
    %c0_3 = arith.constant 0 : index
    %c0_4 = arith.constant 0 : index
    %3 = vector.load %arg3[%c0_3, %c0_4] : memref<256x64xf32, #tpu.memory_space<vmem>>, vector<256x64xf32>
    %cst = arith.constant dense<0.000000e+00> : vector<128x64xf32>
    %4 = tpu.matmul %2, %3, %cst {dimension_numbers = #tpu.dot_dimension_numbers<[1], [0], [0], [1], [0, 0, 1, 1], [], []>} : vector<128x256xf32>, vector<256x64xf32>, vector<128x64xf32> -> vector<128x64xf32>
    %c0_5 = arith.constant 0 : index
    %c0_6 = arith.constant 0 : index
    %5 = vector.load %arg4[%c0_5, %c0_6] : memref<1x64xf32, #tpu.memory_space<vmem>>, vector<1x64xf32>
    %6 = vector.broadcast %5 : vector<1x64xf32> to vector<128x64xf32>
    %7 = arith.addf %4, %6 : vector<128x64xf32>
    %cst_7 = arith.constant 0.000000e+00 : f32
    %8 = vector.broadcast %cst_7 : f32 to vector<128x64xf32>
    %9 = arith.maximumf %7, %8 : vector<128x64xf32>
    %c0_8 = arith.constant 0 : index
    %c0_9 = arith.constant 0 : index
    %10 = vector.load %arg5[%c0_8, %c0_9] : memref<1x64xf32, #tpu.memory_space<vmem>>, vector<1x64xf32>
    %11 = vector.broadcast %10 : vector<1x64xf32> to vector<128x64xf32>
    %12 = arith.mulf %9, %11 : vector<128x64xf32>
    %cst_10 = arith.constant dense<0.000000e+00> : vector<128xf32>
    %13 = vector.multi_reduction <add>, %12, %cst_10 [1] : vector<128x64xf32> to vector<128xf32>
    %c0_11 = arith.constant 0 : index
    %c0_12 = arith.constant 0 : index
    %14 = memref.load %arg6[%c0_11, %c0_12] : memref<1x1xf32, #tpu.memory_space<smem>>
    %15 = vector.broadcast %14 : f32 to vector<128xf32>
    %16 = arith.addf %13, %15 : vector<128xf32>
    %17 = vector.shape_cast %16 : vector<128xf32> to vector<1x128xf32>
    %c0_13 = arith.constant 0 : index
    %c0_14 = arith.constant 0 : index
    %18 = vector.load %arg7[%c0_13, %c0_14] : memref<1x128xf32, #tpu.memory_space<vmem>>, vector<1x128xf32>
    tpu.vector_store %arg7[%c0_13, %c0_14], %17 {strides = array<i32>} : memref<1x128xf32, #tpu.memory_space<vmem>>, vector<1x128xf32>,
    return
  }
  func.func @transform_0(%arg0: i32) -> (i32, i32) {
    %c0_i32 = arith.constant 0 : i32
    %c0_i32_0 = arith.constant 0 : i32
    return %arg0, %c0_i32 : i32, i32
  }
  func.func @transform_1(%arg0: i32) -> (i32, i32) {
    %c0_i32 = arith.constant 0 : i32
    %c0_i32_0 = arith.constant 0 : i32
    return %arg0, %c0_i32 : i32, i32
  }
  func.func @transform_2(%arg0: i32) -> (i32, i32) {
    %c0_i32 = arith.constant 0 : i32
    %c0_i32_0 = arith.constant 0 : i32
    %c0_i32_1 = arith.constant 0 : i32
    return %c0_i32, %c0_i32_0 : i32, i32
  }
  func.func @transform_3(%arg0: i32) -> (i32, i32) {
    %c0_i32 = arith.constant 0 : i32
    %c0_i32_0 = arith.constant 0 : i32
    %c0_i32_1 = arith.constant 0 : i32
    return %c0_i32, %c0_i32_0 : i32, i32
  }
  func.func @transform_4(%arg0: i32) -> (i32, i32) {
    %c0_i32 = arith.constant 0 : i32
    %c0_i32_0 = arith.constant 0 : i32
    %c0_i32_1 = arith.constant 0 : i32
    return %c0_i32, %c0_i32_0 : i32, i32
  }
  func.func @transform_5(%arg0: i32) -> (i32, i32) {
    %c0_i32 = arith.constant 0 : i32
    %c0_i32_0 = arith.constant 0 : i32
    %c0_i32_1 = arith.constant 0 : i32
    return %c0_i32, %c0_i32_0 : i32, i32
  }
  func.func @transform_6(%arg0: i32) -> (i32, i32) {
    %c0_i32 = arith.constant 0 : i32
    %c0_i32_0 = arith.constant 0 : i32
    return %c0_i32, %arg0 : i32, i32
  }
}

</mosaic_0001>

<bundles_post_ra>
// kernel: tpu_custom_call.1
= control target key start
LH: loop header
LB: loop body
LE: loop exit
PB: predicated region body
PF: predicated region fallthrough
CT: control target
= control target key end

     0   :  { %s1030_s0 = inlined_call_operand.vmem [shape: f32[128,128], index: 0, kind: input, shape index: {}]   ;;  %s1031_s1 = inlined_call_operand.vmem [shape: f32[128,128], index: 1, kind: input, shape index: {}]   ;;  %s1032_s2 = inlined_call_operand.vmem [shape: f32[256,64], index: 2, kind: input, shape index: {}]   ;;  %s1033_s3 = inlined_call_operand.vmem [shape: f32[1,64], index: 3, kind: input, shape index: {}]   ;;  %s1034_s4 = inlined_call_operand.vmem [shape: f32[1,64], index: 4, kind: input, shape index: {}]   ;;  %s1035_s5 = inlined_call_operand.<no memory space> [shape: f32[1,1], index: 5, kind: input, shape index: {}]   ;;  %s1036_s6 = inlined_call_operand.hbm [shape: f32[1,128], index: 6, kind: output, shape index: {}]  }
   0x1   :  { %v73_v0 = vld [vmem:[%s1032_s2 + $0x80] sm:$0xff]  ;;  %v74_v1 = vld [vmem:[%s1032_s2 + $0x88] sm:$0xff]  ;;  %v75_v5 = vld [vmem:[%s1032_s2 + $0x90] sm:$0xff] }
   0x2   :  { %v57_v2 = vld [vmem:[%s1032_s2] sm:$0xff]  ;;  %v572_v3 = vpack.c.bf16 %v74_v1, %v73_v0  ;;  %v58_v4 = vld [vmem:[%s1032_s2 + $0x8] sm:$0xff]  ;;  %v76_v6 = vld [vmem:[%s1032_s2 + $0x98] sm:$0xff] }
   0x3   :  { %v574_v7 = vpack.c.bf16 %v58_v4, %v57_v2  ;;  %v576_v8 = vpack.c.bf16 %v76_v6, %v75_v5  ;;  %v59_v9 = vld [vmem:[%s1032_s2 + $0x10] sm:$0xff]  ;;  %v60_v10 = vld [vmem:[%s1032_s2 + $0x18] sm:$0xff]  ;;  %v77_v11 = vld [vmem:[%s1032_s2 + $0xa0] sm:$0xff] }
   0x4   :  { %573 = vmatprep.subr.bf16.mxu0 %v572_v3  ;;  %604 = vmatprep.subr.bf16.mxu1 %v572_v3  ;;  %v78_v12 = vld [vmem:[%s1032_s2 + $0xa8] sm:$0xff]  ;;  %v578_v13 = vpack.c.bf16 %v60_v10, %v59_v9  ;;  %v61_v15 = vld [vmem:[%s1032_s2 + $0x20] sm:$0xff]  ;;  %v79_v17 = vld [vmem:[%s1032_s2 + $0xb0] sm:$0xff] }
   0x5   :  { %575 = vmatpush3.bf16.msra.mxu0 %v574_v7  ;;  %612 = vmatpush3.bf16.msra.mxu1 %v574_v7  ;;  %v580_v14 = vpack.c.bf16 %v78_v12, %v77_v11  ;;  %v62_v16 = vld [vmem:[%s1032_s2 + $0x28] sm:$0xff]  ;;  %v80_v18 = vld [vmem:[%s1032_s2 + $0xb8] sm:$0xff]  ;;  %v63_v21 = vld [vmem:[%s1032_s2 + $0x30] sm:$0xff] }
   0x6   :  { %577 = vmatprep.subr.bf16.mxu0 %v576_v8  ;;  %605 = vmatprep.subr.bf16.mxu1 %v576_v8  ;;  %v582_v19 = vpack.c.bf16 %v62_v16, %v61_v15  ;;  %v584_v20 = vpack.c.bf16 %v80_v18, %v79_v17  ;;  %v64_v22 = vld [vmem:[%s1032_s2 + $0x38] sm:$0xff]  ;;  %v81_v23 = vld [vmem:[%s1032_s2 + $0xc0] sm:$0xff]  ;;  %v82_v24 = vld [vmem:[%s1032_s2 + $0xc8] sm:$0xff] }
   0x7   :  { %v41_v25 = vld [vmem:[%s1031_s1] sm:$0xff]  ;;  %v586_v27 = vpack.c.bf16 %v64_v22, %v63_v21  ;;  %v588_v28 = vpack.c.bf16 %v82_v24, %v81_v23  ;;  %v66_v30 = vld [vmem:[%s1032_s2 + $0x48] sm:$0xff]  ;;  %v83_v31 = vld [vmem:[%s1032_s2 + $0xd0] sm:$0xff] }
   0x8   :  { %160 = vmatprep.mubr.f32.mxu0 %v41_v25  ;;  %v49_v26 = vld [vmem:[%s1031_s1 + $0x40] sm:$0xff]  ;;  %v84_v32 = vld [vmem:[%s1032_s2 + $0xd8] sm:$0xff]  ;;  %v67_v35 = vld [vmem:[%s1032_s2 + $0x50] sm:$0xff] }
   0x9   :  { %579 = vmatpush3.bf16.msra.mxu0 %v578_v13  ;;  %613 = vmatpush3.bf16.msra.mxu1 %v578_v13  ;;  %v65_v29 = vld [vmem:[%s1032_s2 + $0x40] sm:$0xff]  ;;  %v592_v34 = vpack.c.bf16 %v84_v32, %v83_v31  ;;  %v68_v36 = vld [vmem:[%s1032_s2 + $0x58] sm:$0xff]  ;;  %v86_v38 = vld [vmem:[%s1032_s2 + $0xe8] sm:$0xff] }
   0xa   :  { %581 = vmatprep.subr.bf16.mxu0 %v580_v14  ;;  %606 = vmatprep.subr.bf16.mxu1 %v580_v14  ;;  %v590_v33 = vpack.c.bf16 %v66_v30, %v65_v29  ;;  %v85_v37 = vld [vmem:[%s1032_s2 + $0xe0] sm:$0xff]  ;;  %v594_v39 = vpack.c.bf16 %v68_v36, %v67_v35  ;;  %v70_v42 = vld [vmem:[%s1032_s2 + $0x68] sm:$0xff] }
   0xb   :  { %200 = vmatprep.mubr.f32.mxu1 %v49_v26  ;;  %v596_v40 = vpack.c.bf16 %v86_v38, %v85_v37  ;;  %v69_v41 = vld [vmem:[%s1032_s2 + $0x60] sm:$0xff] }
   0xd   :  { %583 = vmatpush3.bf16.msra.mxu0 %v582_v19  ;;  %614 = vmatpush3.bf16.msra.mxu1 %v582_v19 }
   0xe   :  { %585 = vmatprep.subr.bf16.mxu0 %v584_v20  ;;  %607 = vmatprep.subr.bf16.mxu1 %v584_v20 }
  0x11   :  { %587 = vmatpush3.bf16.msra.mxu0 %v586_v27  ;;  %615 = vmatpush3.bf16.msra.mxu1 %v586_v27 }
  0x12   :  { %589 = vmatprep.subr.bf16.mxu0 %v588_v28  ;;  %608 = vmatprep.subr.bf16.mxu1 %v588_v28 }
  0x15   :  { %591 = vmatpush3.bf16.msra.mxu0 %v590_v33  ;;  %616 = vmatpush3.bf16.msra.mxu1 %v590_v33 }
  0x16   :  { %593 = vmatprep.subr.bf16.mxu0 %v592_v34  ;;  %609 = vmatprep.subr.bf16.mxu1 %v592_v34 }
  0x17   :  { %12 = vsyncpa [#allocation4], 0  ;;  %v87_v43 = vld [vmem:[%s1032_s2 + $0xf0] sm:$0xff]  ;;  %v88_v44 = vld [vmem:[%s1032_s2 + $0xf8] sm:$0xff]  ;;  %v598_v45 = vpack.c.bf16 %v70_v42, %v69_v41  ;;  %vm280_vm0 = vcmask 523264   ;;  %vm374_vm1 = vcmask 130112  }
  0x18   :  { %v600_v46 = vpack.c.bf16 %v88_v44, %v87_v43  ;;  %v71_v47 = vld [vmem:[%s1032_s2 + $0x70] sm:$0xff]  ;;  %v72_v48 = vld [vmem:[%s1032_s2 + $0x78] sm:$0xff]  ;;  %v25_v50 = vld [vmem:[%s1030_s0] sm:$0xff]  ;;  %vm381_vm2 = vcmask 195712   ;;  %vm388_vm3 = vcmask 261312   ;;  %vm395_vm4 = vcmask 326912  }
  0x19   :  { %595 = vmatpush3.bf16.msra.mxu0 %v594_v39  ;;  %617 = vmatpush3.bf16.msra.mxu1 %v594_v39  ;;  %v602_v49 = vpack.c.bf16 %v72_v48, %v71_v47  ;;  %v33_v51 = vld [vmem:[%s1030_s0 + $0x40] sm:$0xff]  ;;  %v42_v52 = vld [vmem:[%s1031_s1 + $0x8] sm:$0xff]  ;;  %v43_v56 = vld [vmem:[%s1031_s1 + $0x10] sm:$0xff]  ;;  %vm402_vm5 = vcmask 392512   ;;  %vm409_vm6 = vcmask 458112   ;;  %vm416_vm7 = vcmask 523712  }
  0x1a   :  { %597 = vmatprep.subr.bf16.mxu0 %v596_v40  ;;  %610 = vmatprep.subr.bf16.mxu1 %v596_v40  ;;  %v50_v53 = vld [vmem:[%s1031_s1 + $0x48] sm:$0xff]  ;;  %v51_v57 = vld [vmem:[%s1031_s1 + $0x50] sm:$0xff]  ;;  %v44_v60 = vld [vmem:[%s1031_s1 + $0x18] sm:$0xff]  ;;  %vm423_vm8 = vcmask 589312   ;;  %vm430_vm9 = vcmask 654912   ;;  %vm437_vm10 = vcmask 720512  }
  0x1b   :  { %v26_v54 = vld [vmem:[%s1030_s0 + $0x8] sm:$0xff]  ;;  %v27_v58 = vld [vmem:[%s1030_s0 + $0x10] sm:$0xff]  ;;  %v52_v61 = vld [vmem:[%s1031_s1 + $0x58] sm:$0xff]  ;;  %vm444_vm11 = vcmask 786112   ;;  %vm451_vm12 = vcmask 851712   ;;  %vm458_vm13 = vcmask 917312  }
  0x1c   :  { %v34_v55 = vld [vmem:[%s1030_s0 + $0x48] sm:$0xff]  ;;  %v35_v59 = vld [vmem:[%s1030_s0 + $0x50] sm:$0xff]  ;;  %v28_v62 = vld [vmem:[%s1030_s0 + $0x18] sm:$0xff]  ;;  %vm465_vm14 = vcmask 982912   ;;  %vm472_vm15 = vcmask 1048512  }
  0x1d   :  { %599 = vmatpush3.bf16.msra.mxu0 %v598_v45  ;;  %618 = vmatpush3.bf16.msra.mxu1 %v598_v45  ;;  %v36_v63 = vld [vmem:[%s1030_s0 + $0x58] sm:$0xff]  ;;  %v45_v0 = vld [vmem:[%s1031_s1 + $0x20] sm:$0xff]  ;;  %v46_v4 = vld [vmem:[%s1031_s1 + $0x28] sm:$0xff] }
  0x1e   :  { %601 = vmatprep.subr.bf16.mxu0 %v600_v46  ;;  %611 = vmatprep.subr.bf16.mxu1 %v600_v46  ;;  %v53_v1 = vld [vmem:[%s1031_s1 + $0x60] sm:$0xff]  ;;  %v54_v5 = vld [vmem:[%s1031_s1 + $0x68] sm:$0xff]  ;;  %v47_v8 = vld [vmem:[%s1031_s1 + $0x30] sm:$0xff] }
  0x1f   :  { %v29_v2 = vld [vmem:[%s1030_s0 + $0x20] sm:$0xff]  ;;  %v30_v6 = vld [vmem:[%s1030_s0 + $0x28] sm:$0xff]  ;;  %v55_v9 = vld [vmem:[%s1031_s1 + $0x70] sm:$0xff] }
  0x20   :  { %v37_v3 = vld [vmem:[%s1030_s0 + $0x60] sm:$0xff]  ;;  %v38_v7 = vld [vmem:[%s1030_s0 + $0x68] sm:$0xff]  ;;  %v31_v10 = vld [vmem:[%s1030_s0 + $0x30] sm:$0xff] }
  0x21   :  { %603 = vmatpush3.bf16.msra.mxu0 %v602_v49  ;;  %619 = vmatpush3.bf16.msra.mxu1 %v602_v49  ;;  %v39_v11 = vld [vmem:[%s1030_s0 + $0x70] sm:$0xff]  ;;  %v48_v12 = vld [vmem:[%s1031_s1 + $0x38] sm:$0xff]  ;;  %v876_v18 = vld [vmem:[%s1033_s3] ss:$0 sm:$0xff] }
  0x22   :  { %v56_v13 = vld [vmem:[%s1031_s1 + $0x78] sm:$0xff]  ;;  %v883_v29 = vld [vmem:[%s1034_s4] ss:$0 sm:$0xff] }
  0x23   :  { %v32_v14 = vld [vmem:[%s1030_s0 + $0x38] sm:$0xff] }
  0x24   :  { %161 = vmatmul.mubr.f32.vlgmr.msra.gmra.mrb[0].mxu0 %v25_v50  ;;  %201 = vmatmul.mubr.f32.vlgmr.msra.gmra.mrb[0].mxu1 %v33_v51  ;;  %v40_v15 = vld [vmem:[%s1030_s0 + $0x78] sm:$0xff] }
  0x25   :  { %165 = vmatprep.mubr.f32.mxu0 %v42_v52  ;;  %205 = vmatprep.mubr.f32.mxu1 %v50_v53 }
  0x28   :  { %166 = vmatmul.mubr.f32.gmra.mrb[2].mxu0 %v26_v54  ;;  %206 = vmatmul.mubr.f32.gmra.mrb[2].mxu1 %v34_v55 }
  0x29   :  { %170 = vmatprep.mubr.f32.mxu0 %v43_v56  ;;  %210 = vmatprep.mubr.f32.mxu1 %v51_v57 }
  0x2c   :  { %171 = vmatmul.mubr.f32.gmra.mrb[4].mxu0 %v27_v58  ;;  %211 = vmatmul.mubr.f32.gmra.mrb[4].mxu1 %v35_v59 }
  0x2d   :  { %175 = vmatprep.mubr.f32.mxu0 %v44_v60  ;;  %215 = vmatprep.mubr.f32.mxu1 %v52_v61 }
  0x30   :  { %176 = vmatmul.mubr.f32.gmra.mrb[6].mxu0 %v28_v62  ;;  %216 = vmatmul.mubr.f32.gmra.mrb[6].mxu1 %v36_v63 }
  0x31   :  { %180 = vmatprep.mubr.f32.mxu0 %v45_v0  ;;  %220 = vmatprep.mubr.f32.mxu1 %v53_v1 }
  0x34   :  { %181 = vmatmul.mubr.f32.gmra.mrb[8].mxu0 %v29_v2  ;;  %221 = vmatmul.mubr.f32.gmra.mrb[8].mxu1 %v37_v3 }
  0x35   :  { %185 = vmatprep.mubr.f32.mxu0 %v46_v4  ;;  %225 = vmatprep.mubr.f32.mxu1 %v54_v5 }
  0x38   :  { %186 = vmatmul.mubr.f32.gmra.mrb[10].mxu0 %v30_v6  ;;  %226 = vmatmul.mubr.f32.gmra.mrb[10].mxu1 %v38_v7 }
  0x39   :  { %190 = vmatprep.mubr.f32.mxu0 %v47_v8  ;;  %230 = vmatprep.mubr.f32.mxu1 %v55_v9 }
  0x3c   :  { %191 = vmatmul.mubr.f32.gmra.mrb[12].mxu0 %v31_v10  ;;  %231 = vmatmul.mubr.f32.gmra.mrb[12].mxu1 %v39_v11 }
  0x3d   :  { %195 = vmatprep.mubr.f32.mxu0 %v48_v12  ;;  %235 = vmatprep.mubr.f32.mxu1 %v56_v13 }
  0x40   :  { %196 = vmatmul.mubr.f32.gmra.mrb[14].mxu0 %v32_v14  ;;  %236 = vmatmul.mubr.f32.gmra.mrb[14].mxu1 %v40_v15 }
  0xf7   :  { %v524_v16 = vpop.f32.mrb[0].mxu0  ;;  %v548_v17 = vpop.f32.mrb[0].mxu1 }
  0xf8   :  { %v525_v19 = vpop.f32.mrb[1].mxu0  ;;  %v549_v20 = vpop.f32.mrb[1].mxu1 }
  0xf9   :  { %v526_v21 = vadd.f32 %v525_v19, %v524_v16  ;;  %v550_v22 = vadd.f32 %v549_v20, %v548_v17 }
  0xfb   :  { %v163_v23 = vadd.f32 %v526_v21, %v876_v18  ;;  %v203_v24 = vadd.f32 %v550_v22, %v876_v18  ;;  %v527_v25 = vpop.f32.mrb[2].mxu0  ;;  %v551_v26 = vpop.f32.mrb[2].mxu1 }
  0xfc   :  { %v528_v27 = vpop.f32.mrb[3].mxu0  ;;  %v552_v28 = vpop.f32.mrb[3].mxu1 }
  0xfd   :  { %v241_v30 = vmax.f32 %v163_v23, 0.0  ;;  %v249_v31 = vmax.f32 %v203_v24, 0.0  ;;  %v529_v32 = vadd.f32 %v528_v27, %v527_v25  ;;  %v553_v33 = vadd.f32 %v552_v28, %v551_v26 }
  0xff   :  { %v168_v34 = vadd.f32 %v529_v32, %v876_v18  ;;  %v208_v35 = vadd.f32 %v553_v33, %v876_v18  ;;  %v530_v36 = vpop.f32.mrb[4].mxu0  ;;  %v264_v37 = vmul.f32 %v883_v29, %v241_v30  ;;  %v554_v38 = vpop.f32.mrb[4].mxu1  ;;  %v272_v39 = vmul.f32 %v883_v29, %v249_v31 }
 0x100   :  { %v531_v40 = vpop.f32.mrb[5].mxu0  ;;  %v555_v41 = vpop.f32.mrb[5].mxu1 }
 0x101   :  { %v242_v42 = vmax.f32 %v168_v34, 0.0  ;;  %v250_v43 = vmax.f32 %v208_v35, 0.0  ;;  %v532_v44 = vadd.f32 %v531_v40, %v530_v36  ;;  %v281_v45 = vsel %vm280_vm0, %v264_v37, 0.0 }
 0x102   :  { %282 = vadd.xlane.f32.xlu0 %v281_v45  ;;  %v556_v46 = vadd.f32 %v555_v41, %v554_v38  ;;  %v305_v50 = vsel %vm280_vm0, %v272_v39, 0.0 }
 0x103   :  { %v173_v47 = vadd.f32 %v532_v44, %v876_v18  ;;  %v533_v48 = vpop.f32.mrb[6].mxu0  ;;  %v273_v49 = vmul.f32 %v883_v29, %v250_v43  ;;  %v557_v51 = vpop.f32.mrb[6].mxu1  ;;  %v265_v55 = vmul.f32 %v883_v29, %v242_v42 }
 0x104   :  { %v534_v52 = vpop.f32.mrb[7].mxu0  ;;  %v213_v53 = vadd.f32 %v556_v46, %v876_v18  ;;  %v558_v54 = vpop.f32.mrb[7].mxu1 }
 0x105   :  { %v243_v56 = vmax.f32 %v173_v47, 0.0  ;;  %v535_v57 = vadd.f32 %v534_v52, %v533_v48  ;;  %v308_v58 = vsel %vm280_vm0, %v273_v49, 0.0  ;;  %v559_v59 = vadd.f32 %v558_v54, %v557_v51 }
 0x106   :  { %v251_v60 = vmax.f32 %v213_v53, 0.0  ;;  %309 = vadd.xlane.f32.xlu1 %v308_v58  ;;  %306 = vadd.xlane.f32.xlu0 %v305_v50  ;;  %v284_v3 = vsel %vm280_vm0, %v265_v55, 0.0 }
 0x107   :  { %v178_v61 = vadd.f32 %v535_v57, %v876_v18  ;;  %v536_v62 = vpop.f32.mrb[8].mxu0  ;;  %v218_v63 = vadd.f32 %v559_v59, %v876_v18  ;;  %v266_v0 = vmul.f32 %v883_v29, %v243_v56  ;;  %v560_v1 = vpop.f32.mrb[8].mxu1 }
 0x108   :  { %v537_v2 = vpop.f32.mrb[9].mxu0  ;;  %v274_v4 = vmul.f32 %v883_v29, %v251_v60  ;;  %v561_v5 = vpop.f32.mrb[9].mxu1 }
 0x109   :  { %v244_v6 = vmax.f32 %v178_v61, 0.0  ;;  %v538_v7 = vadd.f32 %v537_v2, %v536_v62  ;;  %v252_v8 = vmax.f32 %v218_v63, 0.0  ;;  %v287_v9 = vsel %vm280_vm0, %v266_v0, 0.0 }
 0x10a   :  { %288 = vadd.xlane.f32.xlu1 %v287_v9  ;;  %285 = vadd.xlane.f32.xlu0 %v284_v3  ;;  %v562_v10 = vadd.f32 %v561_v5, %v560_v1  ;;  %v311_v14 = vsel %vm280_vm0, %v274_v4, 0.0 }
 0x10b   :  { %v183_v11 = vadd.f32 %v538_v7, %v876_v18  ;;  %v539_v12 = vpop.f32.mrb[10].mxu0  ;;  %v267_v13 = vmul.f32 %v883_v29, %v244_v6  ;;  %v563_v15 = vpop.f32.mrb[10].mxu1  ;;  %v275_v16 = vmul.f32 %v883_v29, %v252_v8  ;;  %v363_v6 = vlaneseq }
 0x10c   :  { %v540_v17 = vpop.f32.mrb[11].mxu0  ;;  %v564_v19 = vpop.f32.mrb[11].mxu1  ;;  %v223_v30 = vadd.f32 %v562_v10, %v876_v18 }
 0x10d   :  { %v245_v20 = vmax.f32 %v183_v11, 0.0  ;;  %v541_v21 = vadd.f32 %v540_v17, %v539_v12  ;;  %v290_v22 = vsel %vm280_vm0, %v267_v13, 0.0  ;;  %v565_v23 = vadd.f32 %v564_v19, %v563_v15 }
 0x10e   :  { %291 = vadd.xlane.f32.xlu1 %v290_v22  ;;  %312 = vadd.xlane.f32.xlu0 %v311_v14  ;;  %v314_v26 = vsel %vm280_vm0, %v275_v16, 0.0  ;;  %v253_v42 = vmax.f32 %v223_v30, 0.0  ;;  %v933_v9 = vand.u32 127, %v363_v6  ;;  %v938_v12 = vshrl.u32 %v363_v6, 7 }
 0x10f   :  { %v188_v24 = vadd.f32 %v541_v21, %v876_v18  ;;  %v542_v25 = vpop.f32.mrb[12].mxu0  ;;  %v268_v27 = vmul.f32 %v883_v29, %v245_v20  ;;  %v566_v28 = vpop.f32.mrb[12].mxu1  ;;  %v228_v46 = vadd.f32 %v565_v23, %v876_v18  ;;  %v950_v16 = vstv %s1035_s5  ;;  %s645_s5 = smov [#allocation3]  }
 0x110   :  { %v543_v31 = vpop.f32.mrb[13].mxu0  ;;  %v567_v32 = vpop.f32.mrb[13].mxu1  ;;  %v276_v57 = vmul.f32 %v883_v29, %v253_v42  ;;  %v369_v11 = vadd.s32 4294967288, %v933_v9  ;;  %v941_v13 = vadd.s32 4294967224, %v933_v9  ;;  %v944_v14 = vadd.s32 4294967232, %v933_v9  ;;  %s482_s28 = sshll.u32 %s645_s5, 4  ;;  %s483_s28 = int_to_ptr.vmem [resolvable:$true] %s482_s28 }
 0x111   :  { %v246_v33 = vmax.f32 %v188_v24, 0.0  ;;  %v544_v34 = vadd.f32 %v543_v31, %v542_v25  ;;  %v293_v35 = vsel %vm280_vm0, %v268_v27, 0.0  ;;  %v568_v36 = vadd.f32 %v567_v32, %v566_v28  ;;  %s621_s29 = scalar_lea.vmem %s483_s28, 16  ;;  %s625_s30 = scalar_lea.vmem %s483_s28, 32 }
 0x112   :  { %315 = vadd.xlane.f32.xlu1 %v314_v26  ;;  %294 = vadd.xlane.f32.xlu0 %v293_v35  ;;  %v254_v54 = vmax.f32 %v228_v46, 0.0  ;;  %v317_v62 = vsel %vm280_vm0, %v276_v57, 0.0  ;;  %v376_v15 = vadd.s32 4294967280, %v933_v9  ;;  %v372_v19 = vsub.s32 %v369_v11, %v938_v12  ;;  %p622_p0 = scmp.ne.s32.totalorder %s483_s28, %s621_s29  ;;  %p626_p1 = scmp.lt.s32.totalorder %s483_s28, %s483_s28 }
 0x113   :  { %v193_v37 = vadd.f32 %v544_v34, %v876_v18  ;;  %v545_v38 = vpop.f32.mrb[14].mxu0  ;;  %v269_v39 = vmul.f32 %v883_v29, %v246_v33  ;;  %v233_v40 = vadd.f32 %v568_v36, %v876_v18  ;;  %v569_v41 = vpop.f32.mrb[14].mxu1  ;;  %v383_v21 = vadd.s32 4294967272, %v933_v9  ;;  %p627_p2 = scmp.lt.s32.totalorder %s625_s30, %s621_s29 }
 0x114   :  { %v546_v43 = vpop.f32.mrb[15].mxu0  ;;  %v570_v44 = vpop.f32.mrb[15].mxu1  ;;  %v277_v63 = vmul.f32 %v883_v29, %v254_v54  ;;  %v367_v22 = vsub.s32 %v933_v9, %v938_v12  ;;  %v428_v23 = vsub.s32 %v941_v13, %v938_v12  ;;  %v960_v24 = vadd.s32 4294967216, %v933_v9 }
 0x115   :  { %v247_v45 = vmax.f32 %v193_v37, 0.0  ;;  %v547_v47 = vadd.f32 %v546_v43, %v545_v38  ;;  %v296_v48 = vsel %vm280_vm0, %v269_v39, 0.0  ;;  %v571_v49 = vadd.f32 %v570_v44, %v569_v41  ;;  %p628_p3 = por %p627_p2, %p626_p1 }
 0x116   :  { %297 = vadd.xlane.f32.xlu1 %v296_v48  ;;  %v255_v51 = vmax.f32 %v233_v40, 0.0  ;;  %v320_v1 = vsel %vm280_vm0, %v277_v63, 0.0  ;;  %v390_v25 = vadd.s32 4294967264, %v933_v9  ;;  %v421_v27 = vsub.s32 %v944_v14, %v938_v12 }
 0x117   :  { %v198_v50 = vadd.f32 %v547_v47, %v876_v18  ;;  %v270_v52 = vmul.f32 %v883_v29, %v247_v45  ;;  %v238_v53 = vadd.f32 %v571_v49, %v876_v18  ;;  %v379_v28 = vsub.s32 %v376_v15, %v938_v12  ;;  %p629_p4 = pnand %p628_p3, %p622_p0 }
 0x118   :  { %v278_v60 = vmul.f32 %v883_v29, %v255_v51  ;;  %v397_v31 = vadd.s32 4294967256, %v933_v9  ;;  %v970_v33 = vadd.s32 4294967208, %v933_v9  ;;  %v404_v35 = vadd.s32 4294967248, %v933_v9 }
 0x119   :  { %v248_v55 = vmax.f32 %v198_v50, 0.0  ;;  %v299_v56 = vsel %vm280_vm0, %v270_v52, 0.0  ;;  %v256_v58 = vmax.f32 %v238_v53, 0.0  ;;  %v386_v37 = vsub.s32 %v383_v21, %v938_v12 }
 0x11a   :  { %300 = vadd.xlane.f32.xlu0 %v299_v56  ;;  %v323_v18 = vsel %vm280_vm0, %v278_v60, 0.0  ;;  %v435_v39 = vsub.s32 %v960_v24, %v938_v12  ;;  %v393_v40 = vsub.s32 %v390_v25, %v938_v12  ;;  %v400_v43 = vsub.s32 %v397_v31, %v938_v12 }
 0x11b   :  { %v271_v59 = vmul.f32 %v883_v29, %v248_v55  ;;  %v279_v0 = vmul.f32 %v883_v29, %v256_v58  ;;  %v411_v45 = vadd.s32 4294967240, %v933_v9  ;;  %v442_v47 = vsub.s32 %v970_v33, %v938_v12 }
 0x11c   :  { %v407_v48 = vsub.s32 %v404_v35, %v938_v12  ;;  %v446_v54 = vadd.s32 4294967200, %v933_v9  ;;  %v453_v55 = vadd.s32 4294967192, %v933_v9  ;;  %v460_v63 = vadd.s32 4294967184, %v933_v9 }
 0x11d   :  { %v302_v61 = vsel %vm280_vm0, %v271_v59, 0.0  ;;  %v326_v2 = vsel %vm280_vm0, %v279_v0, 0.0  ;;  %v414_v57 = vsub.s32 %v411_v45, %v938_v12 }
 0x11e   :  { %303 = vadd.xlane.f32.xlu1 %v302_v61  ;;  %318 = vadd.xlane.f32.xlu0 %v317_v62  ;;  %v456_v6 = vsub.s32 %v453_v55, %v938_v12 }
 0x122   :  { %321 = vadd.xlane.f32.xlu1 %v320_v1  ;;  %324 = vadd.xlane.f32.xlu0 %v323_v18 }
 0x126   :  { %327 = vadd.xlane.f32.xlu1 %v326_v2 }
 0x18f   :  { %v283_v3 = vpop.xlane.xlu0 %282 }
 0x190   :  { %v331_v26 = vadd.f32 %v950_v16, %v283_v3 }
 0x192   :  { %v368_v42 = vrot.slane %v331_v26, %v367_v22 }
 0x193   :  { %v931_v4 = vpop.xlane.xlu1 %309  ;;  %v307_v5 = vpop.xlane.xlu0 %306 }
 0x194   :  { %v339_v58 = vadd.f32 %v950_v16, %v307_v5  ;;  %v340_v18 = vadd.f32 %v950_v16, %v931_v4  ;;  %v449_v5 = vsub.s32 %v446_v54, %v938_v12  ;;  %v467_v4 = vadd.s32 4294967176, %v933_v9 }
 0x196   :  { %v422_v11 = vrot.slane %v339_v58, %v421_v27  ;;  %v429_v21 = vrot.slane %v340_v18, %v428_v23 }
 0x197   :  { %v289_v7 = vpop.xlane.xlu1 %288  ;;  %v286_v8 = vpop.xlane.xlu0 %285 }
 0x198   :  { %v332_v20 = vadd.f32 %v950_v16, %v286_v8  ;;  %v333_v32 = vadd.f32 %v950_v16, %v289_v7 }
 0x19a   :  { %v373_v36 = vrot.slane %v332_v20, %v372_v19  ;;  %v380_v46 = vrot.slane %v333_v32, %v379_v28  ;;  %v470_v28 = vsub.s32 %v467_v4, %v938_v12 }
 0x19b   :  { %v292_v10 = vpop.xlane.xlu1 %291  ;;  %v936_v29 = vpop.xlane.xlu0 %312 }
 0x19c   :  { %v334_v38 = vadd.f32 %v950_v16, %v292_v10  ;;  %v375_v50 = vsel %vm374_vm1, %v373_v36, %v368_v42  ;;  %v341_v2 = vadd.f32 %v950_v16, %v936_v29  ;;  %v463_v29 = vsub.s32 %v460_v63, %v938_v12 }
 0x19d   :  { %v382_v59 = vsel %vm381_vm2, %v380_v46, %v375_v50 }
 0x19e   :  { %v387_v51 = vrot.slane %v334_v38, %v386_v37  ;;  %v436_v24 = vrot.slane %v341_v2, %v435_v39 }
 0x19f   :  { %v316_v17 = vpop.xlane.xlu1 %315  ;;  %v295_v30 = vpop.xlane.xlu0 %294 }
 0x1a0   :  { %v335_v41 = vadd.f32 %v950_v16, %v295_v30  ;;  %v389_v0 = vsel %vm388_vm3, %v387_v51, %v382_v59  ;;  %v342_v7 = vadd.f32 %v950_v16, %v316_v17 }
 0x1a2   :  { %v394_v53 = vrot.slane %v335_v41, %v393_v40  ;;  %v443_v26 = vrot.slane %v342_v7, %v442_v47 }
 0x1a3   :  { %v298_v34 = vpop.xlane.xlu1 %297 }
 0x1a4   :  { %v336_v44 = vadd.f32 %v950_v16, %v298_v34  ;;  %v396_v3 = vsel %vm395_vm4, %v394_v53, %v389_v0 }
 0x1a6   :  { %v401_v56 = vrot.slane %v336_v44, %v400_v43 }
 0x1a7   :  { %v301_v49 = vpop.xlane.xlu0 %300 }
 0x1a8   :  { %v337_v52 = vadd.f32 %v950_v16, %v301_v49  ;;  %v403_v8 = vsel %vm402_vm5, %v401_v56, %v396_v3 }
 0x1aa   :  { %v408_v60 = vrot.slane %v337_v52, %v407_v48 }
 0x1ab   :  { %v304_v61 = vpop.xlane.xlu1 %303  ;;  %v319_v62 = vpop.xlane.xlu0 %318 }
 0x1ac   :  { %v338_v1 = vadd.f32 %v950_v16, %v304_v61  ;;  %v410_v14 = vsel %vm409_vm6, %v408_v60, %v403_v8  ;;  %v343_v15 = vadd.f32 %v950_v16, %v319_v62 }
 0x1ae   :  { %v415_v10 = vrot.slane %v338_v1, %v414_v57  ;;  %v450_v13 = vrot.slane %v343_v15, %v449_v5 }
 0x1af   :  { %v322_v19 = vpop.xlane.xlu1 %321  ;;  %v325_v20 = vpop.xlane.xlu0 %324 }
 0x1b0   :  { %v417_v17 = vsel %vm416_vm7, %v415_v10, %v410_v14  ;;  %v344_v22 = vadd.f32 %v950_v16, %v322_v19  ;;  %v345_v25 = vadd.f32 %v950_v16, %v325_v20 }
 0x1b1   :  { %v424_v9 = vsel %vm423_vm8, %v422_v11, %v417_v17 }
 0x1b2   :  { %v431_v27 = vsel %vm430_vm9, %v429_v21, %v424_v9  ;;  %v457_v32 = vrot.slane %v344_v22, %v456_v6  ;;  %v464_v35 = vrot.slane %v345_v25, %v463_v29 }
 0x1b3   :  { %v438_v30 = vsel %vm437_vm10, %v436_v24, %v431_v27  ;;  %v328_v23 = vpop.xlane.xlu1 %327 }
 0x1b4   :  { %v445_v31 = vsel %vm444_vm11, %v443_v26, %v438_v30  ;;  %v346_v33 = vadd.f32 %v950_v16, %v328_v23 }
 0x1b5   :  { %v452_v34 = vsel %vm451_vm12, %v450_v13, %v445_v31 }
 0x1b6   :  { %v471_v36 = vrot.slane %v346_v33, %v470_v28  ;;  %v459_v37 = vsel %vm458_vm13, %v457_v32, %v452_v34 }
 0x1b7   :  { %v466_v38 = vsel %vm465_vm14, %v464_v35, %v459_v37 }
 0x1b8   :  { %v473_v39 = vsel %vm472_vm15, %v471_v36, %v466_v38 }
 0x1b9   :  { %475 = vst [vmem:[#allocation3] sm:$0x1] %v473_v39 }
 0x1ba   :  { %632 = shalt.err (!%p629_p4)
}
 0x1bb   :  { %s633_s9 = scalar_lea.hbm %s1036_s6, 16 }
 0x1bc   :  { %p634_p5 = scmp.ne.s32.totalorder %s1036_s6, %s633_s9  ;;  %p637_p6 = scmp.lt.u32.totalorder %s633_s9, %s1036_s6 }
 0x1be   :  { %p639_p7 = pnand %p637_p6, %p634_p5 }
 0x1c0   :  { %642 = shalt.err (!%p639_p7)
}
 0x1c1   :  { %485 = dma.vmem_to_hbm [thread:$0]  %s483_s28, 16, %s1036_s6, [#allocation4]  }
 0x1c2   :  { %643 = dma.done.wait [#allocation4], 16  }
 0x1c3   :  { %644 = vsyncadd [#allocation4], 4294967280 }
 0x1c4   :  { %489 = vsyncpa [#allocation4], 1 }

</bundles_post_ra>
